<compile_context>
chip_gen: v5e
topology: v5e:2x2
jax: 0.10.0
libtpu: 0.0.40
codegen_flags: <defaults>
</compile_context>

<pallas_src>
import functools

import jax
import jax.numpy as jnp
from jax import lax
from jax.experimental import pallas as pl
from jax.experimental.pallas import tpu as pltpu

# Hyperparameters from CombinedLoss.__init__ defaults.
LAMBDA_REG = 1e-4
ALPHA = 1.0
GAMMA = 2.0
FOCAL_WEIGHT = 1.0
L2_WEIGHT = 1.0
SMOOTH_EPS = 0.1

LANE = 128
CHUNK = 16            # rows per fused compute chunk (2 f32 vregs per array; bf16-tile aligned)
TILE_ROWS_MAX = 8192  # 8192x128 f32 = 4 MiB DMA tile per input
NGROUPS_MAX = 2       # leading "parallel" axis: both TensorCores on v7x; harmless on v5e/v6e


def _round_up(n, m):
    return ((n + m - 1) // m) * m


def _cdiv(a, b):
    return (a + b - 1) // b


def _elem_terms(x, t):
    """Elementwise label-smoothed stable BCE-with-logits and focal weight (f32).

    Used both inside the kernel (per (CHUNK,128) chunk) and for the tiny
    plain-JAX tail, so kernel and tail use identical math.
    """
    # One shared transcendental: e = exp(-|x|) feeds both the stable BCE log
    # term and the sigmoid.
    e = jnp.exp(-jnp.abs(x))
    ts = t * (1.0 - SMOOTH_EPS) + 0.5 * SMOOTH_EPS
    bce = jnp.maximum(x, 0.0) - x * ts + jnp.log1p(e)
    # 1 - sigmoid(x) = where(x>=0, e, 1) / (1 + e); exact divide (not approx).
    one_minus_p = jnp.where(x >= 0.0, e, 1.0) * (1.0 / (1.0 + e))
    is_pos = t == 1.0
    if ALPHA == 1.0:
        # alpha_factor == where(t==1, 1, 0): fold it into the select.
        fw = jnp.where(is_pos, one_minus_p, 0.0)
    else:
        fw = jnp.where(is_pos, one_minus_p, 1.0 - one_minus_p)
    if GAMMA == 2.0:
        fw = fw * fw                        # pow -> plain VPU multiply
    else:
        fw = fw ** GAMMA
    if ALPHA != 1.0:
        fw = jnp.where(is_pos, ALPHA, 1.0 - ALPHA) * fw
    return bce, fw


# ----------------------------------------------------------------------------
# Main loss kernel: one (tile_rows, 128) tile of logits/targets per grid step.
# The tile is processed in (CHUNK, 128) fused chunks accumulated in vregs; the
# per-group (CHUNK, 128) output blocks stay resident across the "arbitrary"
# reduction axis.
# ----------------------------------------------------------------------------
def _loss_tile_kernel(x_ref, t_ref, bce_out_ref, fw_out_ref, *, n_chunks):
    i = pl.program_id(1)   # reduction axis within the group

    @pl.when(i == 0)
    def _init():
        bce_out_ref[...] = jnp.zeros_like(bce_out_ref)
        fw_out_ref[...] = jnp.zeros_like(fw_out_ref)

    def chunk_body(c, carry):
        bce_acc, fw_acc = carry
        r = pl.multiple_of(c * CHUNK, CHUNK)
        x = x_ref[pl.ds(r, CHUNK), :].astype(jnp.float32)
        t = t_ref[pl.ds(r, CHUNK), :].astype(jnp.float32)
        bce, fw = _elem_terms(x, t)
        return bce_acc + bce, fw_acc + fw

    zero = jnp.zeros((CHUNK, LANE), jnp.float32)
    bce_acc, fw_acc = lax.fori_loop(0, n_chunks, chunk_body, (zero, zero),
                                    unroll=min(8, n_chunks))

    # Single writeback per tile into the resident accumulator blocks.
    bce_out_ref[...] += bce_acc
    fw_out_ref[...] += fw_acc


def combined_loss(inputs, targets, params, *,
                  tile_rows_max=TILE_ROWS_MAX, ngroups_max=NGROUPS_MAX,
                  cast_targets_bf16=True):
    """inputs/targets: (B, C, H, W) logits / {0,1} labels. params: list of arrays."""
    total = int(inputs.size)
    x_flat = inputs.reshape(-1)
    t_flat = targets.reshape(-1)

    bce_sum = jnp.zeros((), jnp.float32)
    fw_sum = jnp.zeros((), jnp.float32)

    rows_avail = total // LANE
    covered = 0

    if rows_avail >= CHUNK:
        tile_rows_max = max(CHUNK, (int(tile_rows_max) // CHUNK) * CHUNK)
        # Groups: at most one per available chunk; 2 shards v7x's TensorCores.
        ngroups = max(1, min(int(ngroups_max), rows_avail // CHUNK))
        # Number of tiles: aim for tile_rows ~ tile_rows_max, multiple of ngroups.
        n_tiles = _round_up(_cdiv(rows_avail, tile_rows_max), ngroups)
        if rows_avail // n_tiles < CHUNK:
            # Too many tiles for the available chunks; one tile per group is
            # always legal because ngroups * CHUNK <= rows_avail.
            n_tiles = ngroups
        tile_rows = min(tile_rows_max, ((rows_avail // n_tiles) // CHUNK) * CHUNK)
        tiles_per_group = n_tiles // ngroups
        covered_rows = n_tiles * tile_rows          # grid covers this EXACTLY
        covered = covered_rows * LANE

        # Lane-dense slabs over the exactly-tiled prefix (no jnp.pad copy).
        x2d = x_flat[:covered].reshape(covered_rows, LANE)
        t2d = t_flat[:covered].reshape(covered_rows, LANE)
        if cast_targets_bf16:
            # Exact for {0,1} hard labels; halves target HBM traffic (v5e/v6e win).
            t2d = t2d.astype(jnp.bfloat16)

        kernel = functools.partial(_loss_tile_kernel, n_chunks=tile_rows // CHUNK)

        in_spec = pl.BlockSpec(
            (tile_rows, LANE),
            lambda g, i, tpg=tiles_per_group: (g * tpg + i, 0))
        out_spec = pl.BlockSpec((CHUNK, LANE), lambda g, i: (g, 0))
        out_sds = jax.ShapeDtypeStruct((ngroups * CHUNK, LANE), jnp.float32)

        bce_part, fw_part = pl.pallas_call(
            kernel,
            out_shape=(out_sds, out_sds),
            grid_spec=pltpu.PrefetchScalarGridSpec(
                num_scalar_prefetch=0,
                grid=(ngroups, tiles_per_group),
                in_specs=[in_spec, in_spec],
                out_specs=(out_spec, out_spec),
            ),
            compiler_params=pltpu.CompilerParams(
                dimension_semantics=("parallel", "arbitrary"),
                vmem_limit_bytes=32 * 1024 * 1024,   # safe on v5e/v6e/v7x
            ),
        )(x2d, t2d)

        bce_sum = jnp.sum(bce_part)
        fw_sum = jnp.sum(fw_part)

    if covered < total:
        # Tiny ragged remainder (a few thousand elements at most in realistic
        # cases): reduced in plain JAX with identical math and added in.
        xt = x_flat[covered:].astype(jnp.float32)
        tt = t_flat[covered:].astype(jnp.float32)
        bce_t, fw_t = _elem_terms(xt, tt)
        bce_sum = bce_sum + jnp.sum(bce_t)
        fw_sum = fw_sum + jnp.sum(fw_t)

    inv_n = 1.0 / float(total)
    mean_bce = bce_sum * inv_n
    mean_fw = fw_sum * inv_n

    # L2 regularization: sum of per-parameter 2-norms.  Tiny vs. the main
    # stream, so plain JAX (one pallas_call per small param is pure overhead).
    l2_reg = (L2_WEIGHT * LAMBDA_REG) * sum(
        jnp.sqrt(jnp.sum(jnp.square(p.astype(jnp.float32)))) for p in params
    )

    # mean(focal) = FOCAL_WEIGHT * mean(bce) * mean(fw)
    return mean_bce * (1.0 + FOCAL_WEIGHT * mean_fw) + l2_reg


# ----------------------------------------------------------------------------
# Pure-JAX reference (direct translation of the PyTorch forward).
# ----------------------------------------------------------------------------
def reference_loss(inputs, targets, params):
    x = inputs.astype(jnp.float32)
    t = targets.astype(jnp.float32)
    ts = t * (1.0 - SMOOTH_EPS) + 0.5 * SMOOTH_EPS
    bce = jnp.mean(jnp.maximum(x, 0.0) - x * ts + jnp.log1p(jnp.exp(-jnp.abs(x))))
    l2 = L2_WEIGHT * LAMBDA_REG * sum(
        jnp.sqrt(jnp.sum(p.astype(jnp.float32) ** 2)) for p in params
    )
    probs = jax.nn.sigmoid(x)
    af = jnp.where(t == 1.0, ALPHA, 1.0 - ALPHA)
    fw = af * jnp.where(t == 1.0, 1.0 - probs, probs) ** GAMMA
    focal = jnp.mean(FOCAL_WEIGHT * bce * fw)
    return bce + focal + l2


if __name__ == "__main__":
    key = jax.random.PRNGKey(0)
    (k_x, k_t, k_w1, k_b1, k_w2, k_b2,
     k_x2, k_t2, k_x3, k_t3) = jax.random.split(key, 10)

    # Primary small case matching the module's NCHW usage.
    B, C, H, W = 2, 4, 16, 16
    inputs = jax.random.normal(k_x, (B, C, H, W), dtype=jnp.float32)
    targets = jax.random.bernoulli(k_t, p=0.3, shape=(B, C, H, W)).astype(jnp.float32)

    # Deterministic synthetic "model" parameters (conv + linear style shapes).
    params = [
        0.1 * jax.random.normal(k_w1, (C, C, 3, 3), dtype=jnp.float32),   # conv weight
        0.1 * jax.random.normal(k_b1, (C,), dtype=jnp.float32),           # conv bias
        0.1 * jax.random.normal(k_w2, (10, 64), dtype=jnp.float32),       # linear weight
        0.1 * jax.random.normal(k_b2, (10,), dtype=jnp.float32),          # linear bias
    ]

    loss = jax.block_until_ready(combined_loss(inputs, targets, params))
    ref = reference_loss(inputs, targets, params)
    assert jnp.allclose(loss, ref, rtol=1e-5, atol=1e-6), (loss, ref)

    # Ragged case: odd element count with small tiles so the two-group split,
    # multi-tile accumulation and the plain-JAX ragged tail are all exercised.
    shape2 = (2, 3, 33, 65)
    inputs2 = jax.random.normal(k_x2, shape2, dtype=jnp.float32)
    targets2 = jax.random.bernoulli(k_t2, p=0.3, shape=shape2).astype(jnp.float32)
    loss2 = jax.block_until_ready(
        combined_loss(inputs2, targets2, params, tile_rows_max=32, ngroups_max=2)
    )
    ref2 = reference_loss(inputs2, targets2, params)
    assert jnp.allclose(loss2, ref2, rtol=1e-5, atol=1e-6), (loss2, ref2)

    # Larger exact-cover case with default tiling: exercises the fused,
    # partially-unrolled multi-chunk loop (n_chunks > 1) and both groups.
    shape3 = (2, 8, 64, 128)
    inputs3 = jax.random.normal(k_x3, shape3, dtype=jnp.float32)
    targets3 = jax.random.bernoulli(k_t3, p=0.3, shape=shape3).astype(jnp.float32)
    loss3 = jax.block_until_ready(combined_loss(inputs3, targets3, params))
    ref3 = reference_loss(inputs3, targets3, params)
    assert jnp.allclose(loss3, ref3, rtol=1e-5, atol=1e-5), (loss3, ref3)

    print("KERNEL_OK")
</pallas_src>

<mosaic_0001>
module attributes {stable_mosaic.version = 11 : i64} {
  func.func @_loss_tile_kernel(%arg0: i32, %arg1: i32, %arg2: memref<16x128xf32, #tpu.memory_space<vmem>>, %arg3: memref<16x128xbf16, #tpu.memory_space<vmem>>, %arg4: memref<16x128xf32, #tpu.memory_space<vmem>>, %arg5: memref<16x128xf32, #tpu.memory_space<vmem>>) attributes {dimension_semantics = [#tpu.dimension_semantics<parallel>, #tpu.dimension_semantics<arbitrary>], iteration_bounds = array<i64: 1, 1>, scalar_prefetch = 0 : i64, scratch_operands = 0 : i64, tpu.core_type = #tpu.core_type<tc>, window_params = [{transform_indices = @transform_0, window_bounds = array<i64: 16, 128>}, {transform_indices = @transform_1, window_bounds = array<i64: 16, 128>}, {transform_indices = @transform_2, window_bounds = array<i64: 16, 128>}, {transform_indices = @transform_3, window_bounds = array<i64: 16, 128>}]} {
    %c0_i32 = arith.constant 0 : i32
    %0 = arith.cmpi eq, %arg1, %c0_i32 : i32
    %1 = arith.extui %0 : i1 to i32
    %c0_i32_0 = arith.constant 0 : i32
    %2 = arith.cmpi ne, %1, %c0_i32_0 : i32
    scf.if %2 {
      %cst_21 = arith.constant 0.000000e+00 : f32
      %47 = vector.broadcast %cst_21 : f32 to vector<16x128xf32>
      %c0_22 = arith.constant 0 : index
      %c0_23 = arith.constant 0 : index
      %48 = vector.load %arg4[%c0_22, %c0_23] : memref<16x128xf32, #tpu.memory_space<vmem>>, vector<16x128xf32>
      tpu.vector_store %arg4[%c0_22, %c0_23], %47 {strides = array<i32>} : memref<16x128xf32, #tpu.memory_space<vmem>>, vector<16x128xf32>,
      %cst_24 = arith.constant 0.000000e+00 : f32
      %49 = vector.broadcast %cst_24 : f32 to vector<16x128xf32>
      %c0_25 = arith.constant 0 : index
      %c0_26 = arith.constant 0 : index
      %50 = vector.load %arg5[%c0_25, %c0_26] : memref<16x128xf32, #tpu.memory_space<vmem>>, vector<16x128xf32>
      tpu.vector_store %arg5[%c0_25, %c0_26], %49 {strides = array<i32>} : memref<16x128xf32, #tpu.memory_space<vmem>>, vector<16x128xf32>,
    } else {
    }
    %cst = arith.constant 0.000000e+00 : f32
    %3 = vector.broadcast %cst : f32 to vector<16x128xf32>
    %c0_i32_1 = arith.constant 0 : i32
    %c16_i32 = arith.constant 16 : i32
    %4 = arith.muli %c0_i32_1, %c16_i32 : i32
    %5 = tpu.assume_multiple %4, 16 : i32
    %6 = arith.index_cast %5 : i32 to index
    %c0 = arith.constant 0 : index
    %7 = vector.load %arg2[%6, %c0] : memref<16x128xf32, #tpu.memory_space<vmem>>, vector<16x128xf32>
    %8 = arith.index_cast %5 : i32 to index
    %c0_2 = arith.constant 0 : index
    %9 = vector.load %arg3[%8, %c0_2] : memref<16x128xbf16, #tpu.memory_space<vmem>>, vector<16x128xbf16>
    %10 = arith.extf %9 : vector<16x128xbf16> to vector<16x128xf32>
    %11 = math.absf %7 : vector<16x128xf32>
    %cst_3 = arith.constant 0.000000e+00 : f32
    %12 = vector.broadcast %cst_3 : f32 to vector<16x128xf32>
    %13 = arith.subf %12, %11 : vector<16x128xf32>
    %14 = math.exp %13 : vector<16x128xf32>
    %cst_4 = arith.constant 0.899999976 : f32
    %15 = vector.broadcast %cst_4 : f32 to vector<16x128xf32>
    %16 = arith.mulf %10, %15 : vector<16x128xf32>
    %cst_5 = arith.constant 5.000000e-02 : f32
    %17 = vector.broadcast %cst_5 : f32 to vector<16x128xf32>
    %18 = arith.addf %16, %17 : vector<16x128xf32>
    %cst_6 = arith.constant 0.000000e+00 : f32
    %19 = vector.broadcast %cst_6 : f32 to vector<16x128xf32>
    %20 = arith.maximumf %7, %19 : vector<16x128xf32>
    %21 = arith.mulf %7, %18 : vector<16x128xf32>
    %22 = arith.subf %20, %21 : vector<16x128xf32>
    %23 = math.log1p %14 : vector<16x128xf32>
    %24 = arith.addf %22, %23 : vector<16x128xf32>
    %cst_7 = arith.constant 0.000000e+00 : f32
    %25 = vector.broadcast %cst_7 : f32 to vector<16x128xf32>
    %26 = arith.cmpf oge, %7, %25 : vector<16x128xf32>
    %cst_8 = arith.constant 1.000000e+00 : f32
    %27 = vector.broadcast %cst_8 : f32 to vector<16x128xf32>
    %28 = arith.select %26, %14, %27 : vector<16x128xi1>, vector<16x128xf32>
    %cst_9 = arith.constant 1.000000e+00 : f32
    %29 = vector.broadcast %cst_9 : f32 to vector<16x128xf32>
    %30 = arith.addf %29, %14 : vector<16x128xf32>
    %cst_10 = arith.constant 1.000000e+00 : f32
    %31 = vector.broadcast %cst_10 : f32 to vector<16x128xf32>
    %32 = arith.divf %31, %30 : vector<16x128xf32>
    %33 = arith.mulf %28, %32 : vector<16x128xf32>
    %cst_11 = arith.constant 1.000000e+00 : f32
    %34 = vector.broadcast %cst_11 : f32 to vector<16x128xf32>
    %35 = arith.cmpf oeq, %10, %34 : vector<16x128xf32>
    %cst_12 = arith.constant 0.000000e+00 : f32
    %36 = vector.broadcast %cst_12 : f32 to vector<16x128xf32>
    %37 = arith.select %35, %33, %36 : vector<16x128xi1>, vector<16x128xf32>
    %38 = arith.mulf %37, %37 : vector<16x128xf32>
    %39 = arith.addf %3, %24 : vector<16x128xf32>
    %40 = arith.addf %3, %38 : vector<16x128xf32>
    %c1_i32 = arith.constant 1 : i32
    %c0_13 = arith.constant 0 : index
    %c0_14 = arith.constant 0 : index
    %41 = vector.load %arg4[%c0_13, %c0_14] : memref<16x128xf32, #tpu.memory_space<vmem>>, vector<16x128xf32>
    %42 = arith.addf %41, %39 : vector<16x128xf32>
    %c0_15 = arith.constant 0 : index
    %c0_16 = arith.constant 0 : index
    %43 = vector.load %arg4[%c0_15, %c0_16] : memref<16x128xf32, #tpu.memory_space<vmem>>, vector<16x128xf32>
    tpu.vector_store %arg4[%c0_15, %c0_16], %42 {strides = array<i32>} : memref<16x128xf32, #tpu.memory_space<vmem>>, vector<16x128xf32>,
    %c0_17 = arith.constant 0 : index
    %c0_18 = arith.constant 0 : index
    %44 = vector.load %arg5[%c0_17, %c0_18] : memref<16x128xf32, #tpu.memory_space<vmem>>, vector<16x128xf32>
    %45 = arith.addf %44, %40 : vector<16x128xf32>
    %c0_19 = arith.constant 0 : index
    %c0_20 = arith.constant 0 : index
    %46 = vector.load %arg5[%c0_19, %c0_20] : memref<16x128xf32, #tpu.memory_space<vmem>>, vector<16x128xf32>
    tpu.vector_store %arg5[%c0_19, %c0_20], %45 {strides = array<i32>} : memref<16x128xf32, #tpu.memory_space<vmem>>, vector<16x128xf32>,
    return
  }
  func.func @transform_0(%arg0: i32, %arg1: i32) -> (i32, i32) {
    %c1_i32 = arith.constant 1 : i32
    %0 = arith.muli %arg0, %c1_i32 : i32
    %1 = arith.addi %0, %arg1 : i32
    %c0_i32 = arith.constant 0 : i32
    %c0_i32_0 = arith.constant 0 : i32
    return %1, %c0_i32 : i32, i32
  }
  func.func @transform_1(%arg0: i32, %arg1: i32) -> (i32, i32) {
    %c1_i32 = arith.constant 1 : i32
    %0 = arith.muli %arg0, %c1_i32 : i32
    %1 = arith.addi %0, %arg1 : i32
    %c0_i32 = arith.constant 0 : i32
    %c0_i32_0 = arith.constant 0 : i32
    return %1, %c0_i32 : i32, i32
  }
  func.func @transform_2(%arg0: i32, %arg1: i32) -> (i32, i32) {
    %c0_i32 = arith.constant 0 : i32
    %c0_i32_0 = arith.constant 0 : i32
    return %arg0, %c0_i32 : i32, i32
  }
  func.func @transform_3(%arg0: i32, %arg1: i32) -> (i32, i32) {
    %c0_i32 = arith.constant 0 : i32
    %c0_i32_0 = arith.constant 0 : i32
    return %arg0, %c0_i32 : i32, i32
  }
}

</mosaic_0001>

<bundles_post_ra>
// kernel: tpu_custom_call.1
= control target key start
LH: loop header
LB: loop body
LE: loop exit
PB: predicated region body
PF: predicated region fallthrough
CT: control target
= control target key end

     0   :  { %9 = vsyncpa [#allocation3], 0  ;;  %s443_s0 = inlined_call_operand.hbm [shape: f32[16,128], index: 0, kind: input, shape index: {}]   ;;  %s444_s1 = inlined_call_operand.hbm [shape: bf16[16,128], index: 1, kind: input, shape index: {}]   ;;  %s445_s2 = inlined_call_operand.hbm [shape: f32[16,128], index: 2, kind: output, shape index: {0}]   ;;  %s446_s3 = inlined_call_operand.hbm [shape: f32[16,128], index: 3, kind: output, shape index: {1}]  }
   0x1   :  { %10 = vsyncpa [#allocation6], 0 }
   0x2   :  { %11 = vsyncpa [#allocation4], 0 }
   0x3   :  { %12 = vsyncpa [#allocation9], 0  ;;  %s21_s14 = sshll.u32 %s443_s0, 4  ;;  %s338_s15 = smov [#allocation2]   ;;  %s22_s14 = int_to_ptr.hbm [resolvable:$true] %s21_s14 }
   0x4   :  { %s23_s16 = sshll.u32 %s338_s15, 4  ;;  %s38_s19 = sshll.u32 %s444_s1, 4  ;;  %s24_s16 = int_to_ptr.vmem [resolvable:$true] %s23_s16  ;;  %s39_s19 = int_to_ptr.hbm [resolvable:$true] %s38_s19 }
   0x5   :  { %s339_s20 = smov 128   ;;  %s340_s21 = smov 8  }
   0x6   :  { %29 = dma.hbm_to_vmem [thread:$0]  %s22_s14, 256, %s24_s16, [#allocation3], %s339_s20, %s339_s20, %s340_s21  }
   0x7   :  { %s341_s22 = smov [#allocation5]   ;;  %s342_s24 = smov 64  }
   0x8   :  { %s40_s23 = sshll.u32 %s341_s22, 4  ;;  %s343_s0 = smov 4   ;;  %s41_s23 = int_to_ptr.vmem [resolvable:$true] %s40_s23 }
   0x9   :  { %46 = dma.hbm_to_vmem [thread:$0]  %s39_s19, 128, %s41_s23, [#allocation6], %s342_s24, %s342_s24, %s343_s0  }
   0xa   :  { %330 = dma.done.wait [#allocation3], 256  }
   0xb   :  { %331 = vsyncadd [#allocation3], 4294967040 }
   0xc   :  { %332 = dma.done.wait [#allocation6], 128  }
   0xd   :  { %333 = vsyncadd [#allocation6], 4294967168  ;;  %v375_v0 = vld [vmem:[#allocation2] sm:$0xff]  ;;  %v377_v1 = vld [vmem:[#allocation2 + $0x8] sm:$0xff]  ;;  %s344_s1 = smov [#allocation7]   ;;  %s177_s28 = sshll.u32 %s445_s2, 4  ;;  %s178_s28 = int_to_ptr.hbm [resolvable:$true] %s177_s28 }
   0xe   :  { %v73_v2 = vand.u32 2147483647, %v375_v0  ;;  %v74_v3 = vand.u32 2147483647, %v377_v1  ;;  %v381_v4 = vld [vmem:[#allocation5] sm:$0xff]   ;;  %v85_v22 = vmax.f32 %v375_v0, 0.0 }
   0xf   :  { %v211_v8 = vunpack.c.l.bf16 %v381_v4  ;;  %v212_v10 = vunpack.c.h.bf16 %v381_v4  ;;  %v86_v25 = vmax.f32 %v377_v1, 0.0  ;;  %vm111_vm1 = vcmp.ge.f32.partialorder %v375_v0, 0.0  ;;  %s175_s25 = sshll.u32 %s344_s1, 4  ;;  %s345_s2 = smov [#allocation8]   ;;  %s176_s25 = int_to_ptr.vmem [resolvable:$true] %s175_s25 }
  0x10   :  { %v75_v5 = vsub.f32 0.0, %v73_v2  ;;  %v76_v6 = vsub.f32 0.0, %v74_v3  ;;  %vm112_vm8 = vcmp.ge.f32.partialorder %v377_v1, 0.0  ;;  %s188_s29 = sshll.u32 %s345_s2, 4  ;;  %s190_s5 = sshll.u32 %s446_s3, 4  ;;  %s189_s29 = int_to_ptr.vmem [resolvable:$true] %s188_s29  ;;  %s191_s5 = int_to_ptr.hbm [resolvable:$true] %s190_s5 }
  0x11   :  { %v81_v11 = vmul.f32 0.9, %v211_v8  ;;  %v82_v12 = vmul.f32 0.9, %v212_v10  ;;  %vm149_vm12 = vcmp.eq.f32.partialorder %v211_v8, 1.0  ;;  %vm150_vm13 = vcmp.eq.f32.partialorder %v212_v10, 1.0 }
  0x12   :  { %v77_v7 = vmul.f32 1.442695, %v75_v5  ;;  %v79_v9 = vmul.f32 1.442695, %v76_v6 }
  0x13   :  { %v83_v15 = vadd.f32 0.05, %v81_v11  ;;  %v84_v18 = vadd.f32 0.05, %v82_v12 }
  0x14   :  { %222 = vpow2.f32 %v77_v7 }
  0x15   :  { %224 = vpow2.f32 %v79_v9  ;;  %v87_v23 = vmul.f32 %v83_v15, %v375_v0  ;;  %v88_v26 = vmul.f32 %v84_v18, %v377_v1 }
  0x17   :  { %v89_v31 = vsub.f32 %v85_v22, %v87_v23  ;;  %v90_v35 = vsub.f32 %v86_v25, %v88_v26 }
  0x1a   :  { %v223_v13 = vpop.eup %222 }
  0x1b   :  { %v389_v14 = vpop.eup %224  ;;  %v91_v16 = vadd.f32 1.0, %v223_v13  ;;  %v94_v17 = vmul.f32 -0.5, %v223_v13  ;;  %v97_v24 = vand.u32 2147483647, %v223_v13  ;;  %v113_v58 = vsel %vm111_vm1, %v223_v13, 1.0 }
  0x1c   :  { %v100_v19 = vadd.f32 1.0, %v389_v14  ;;  %v103_v20 = vmul.f32 -0.5, %v389_v14  ;;  %v106_v28 = vand.u32 2147483647, %v389_v14  ;;  %v114_v63 = vsel %vm112_vm8, %v389_v14, 1.0 }
  0x1d   :  { %226 = vlog2.f32 %v91_v16  ;;  %v95_v21 = vadd.f32 1.0, %v94_v17  ;;  %vm398_vm0 = vcmp.lt.f32.partialorder %v97_v24, 0.0004427343  ;;  %vm122_vm3 = vweird.f32 %v91_v16 }
  0x1e   :  { %228 = vrcp.f32 %v91_v16  ;;  %v104_v27 = vadd.f32 1.0, %v103_v20  ;;  %vm404_vm2 = vcmp.lt.f32.partialorder %v106_v28, 0.0004427343  ;;  %v126_v40 = vand.u32 2147483647, %v91_v16 }
  0x1f   :  { %230 = vlog2.f32 %v100_v19  ;;  %v96_v29 = vmul.f32 %v223_v13, %v95_v21  ;;  %v128_v44 = vand.u32 2147483648, %v91_v16  ;;  %vm137_vm4 = vweird.f32 %v100_v19 }
  0x20   :  { %232 = vrcp.f32 %v100_v19  ;;  %v105_v36 = vmul.f32 %v389_v14, %v104_v27  ;;  %v141_v49 = vand.u32 2147483647, %v100_v19  ;;  %v143_v50 = vand.u32 2147483648, %v100_v19 }
  0x21   :  { %v129_v55 = vor.u32 1.1754944e-38, %v128_v44  ;;  %vm127_vm9 = vcmp.eq.f32.partialorder %v126_v40, 8.507059e+37 }
  0x22   :  { %v144_v59 = vor.u32 1.1754944e-38, %v143_v50  ;;  %vm142_vm11 = vcmp.eq.f32.partialorder %v141_v49, 8.507059e+37 }
  0x23   :  { %v227_v30 = vpop.eup %226 }
  0x24   :  { %v229_v33 = vpop.eup %228  ;;  %v93_v34 = vmul.f32 0.6931472, %v227_v30 }
  0x25   :  { %v231_v37 = vpop.eup %230  ;;  %v118_v39 = vmul.f32 %v229_v33, %v91_v16  ;;  %vm123_vm5 = vweird.f32 %v229_v33 }
  0x26   :  { %v233_v41 = vpop.eup %232  ;;  %v99_v42 = vsel %vm398_vm0, %v96_v29, %v93_v34  ;;  %v102_v43 = vmul.f32 0.6931472, %v231_v37  ;;  %vm416_vm7 = vmor %vm122_vm3, %vm123_vm5 }
  0x27   :  { %v109_v45 = vadd.f32 %v99_v42, %v89_v31  ;;  %v119_v46 = vsub.f32 1.0, %v118_v39  ;;  %v133_v47 = vmul.f32 %v233_v41, %v100_v19  ;;  %vm138_vm6 = vweird.f32 %v233_v41 }
  0x28   :  { %v108_v48 = vsel %vm404_vm2, %v105_v36, %v102_v43  ;;  %vm139_vm10 = vmor %vm137_vm4, %vm138_vm6 }
  0x29   :  { %v110_v51 = vadd.f32 %v108_v48, %v90_v35  ;;  %v120_v52 = vmul.f32 %v229_v33, %v119_v46  ;;  %v134_v53 = vsub.f32 1.0, %v133_v47  ;;  %163 = vst [vmem:[#allocation7] sm:$0xff] %v109_v45 }
  0x2b   :  { %v121_v56 = vadd.f32 %v229_v33, %v120_v52  ;;  %v135_v57 = vmul.f32 %v233_v41, %v134_v53  ;;  %164 = vst [vmem:[#allocation7 + $0x8] sm:$0xff] %v110_v51 }
  0x2c   :  { %183 = dma.vmem_to_hbm [thread:$0]  %s176_s25, 256, %s178_s28, [#allocation4], %s339_s20, %s339_s20, %s340_s21  }
  0x2d   :  { %v125_v60 = vsel %vm416_vm7, %v229_v33, %v121_v56  ;;  %v136_v61 = vadd.f32 %v233_v41, %v135_v57 }
  0x2e   :  { %v130_v62 = vsel %vm127_vm9, %v129_v55, %v125_v60 }
  0x2f   :  { %v147_v0 = vmul.f32 %v130_v62, %v113_v58  ;;  %v140_v2 = vsel %vm139_vm10, %v233_v41, %v136_v61 }
  0x30   :  { %v145_v3 = vsel %vm142_vm11, %v144_v59, %v140_v2 }
  0x31   :  { %v151_v5 = vsel %vm149_vm12, %v147_v0, 0.0  ;;  %v148_v6 = vmul.f32 %v145_v3, %v114_v63 }
  0x32   :  { %v153_v7 = vmul.f32 %v151_v5, %v151_v5 }
  0x33   :  { %v152_v9 = vsel %vm150_vm13, %v148_v6, 0.0 }
  0x34   :  { %v154_v1 = vmul.f32 %v152_v9, %v152_v9  ;;  %169 = vst [vmem:[#allocation8] sm:$0xff] %v153_v7 }
  0x36   :  { %170 = vst [vmem:[#allocation8 + $0x8] sm:$0xff] %v154_v1 }
  0x37   :  { %196 = dma.vmem_to_hbm [thread:$0]  %s189_s29, 256, %s191_s5, [#allocation9], %s339_s20, %s339_s20, %s340_s21  }
  0x38   :  { %334 = dma.done.wait [#allocation4], 256  }
  0x39   :  { %335 = vsyncadd [#allocation4], 4294967040 }
  0x3a   :  { %336 = dma.done.wait [#allocation9], 256  }
  0x3b   :  { %337 = vsyncadd [#allocation9], 4294967040 }
  0x3c   :  { %205 = vsyncpa [#allocation3], 1 }
  0x3d   :  { %206 = vsyncpa [#allocation6], 1 }
  0x3e   :  { %207 = vsyncpa [#allocation4], 1 }
  0x3f   :  { %208 = vsyncpa [#allocation9], 1 }

</bundles_post_ra>
